<compile_context>
chip_gen: v7x
topology: tpu7x:2x2x1
jax: 0.10.0
libtpu: 0.0.40
codegen_flags: <defaults>
</compile_context>

<pallas_src>
import jax
import jax.numpy as jnp
from jax.experimental import pallas as pl
from jax.experimental.pallas import tpu as pltpu  # noqa: F401  (TPU backend)

# ----- problem sizes (small, deterministic, consistent with the module) -----
BATCH = 8
IN_FEATURES = 32        # np.prod(MODEL_INPUT_SHAPE)
HIDDEN1 = 20
HIDDEN2 = 10
CLASSES = 4             # Y_train.shape[1]

LANES = 128             # lane-pad every "out_features" dim to one vreg width
K2 = 32                 # HIDDEN1 (20) padded to 32 rows for w2's K dim
K3 = 16                 # HIDDEN2 (10) padded to 16 rows for w3's K dim
NEG_MASK = -1e30        # baked softmax mask for padded class lanes (f32 safe)

# ----- packed-parameter row layout (all segments start on 8-row boundaries) --
ROW_W1 = 0                       # w1: (IN_FEATURES, LANES), real (32, 20)
ROW_B1 = ROW_W1 + IN_FEATURES    # 32: b1 row, real (20,)
ROW_W2 = ROW_B1 + 8              # 40: w2: (K2, LANES), real (20, 10)
ROW_B2 = ROW_W2 + K2             # 72: b2 row, real (10,)
ROW_W3 = ROW_B2 + 8              # 80: w3: (K3, LANES), real (10, 4)
ROW_B3 = ROW_W3 + K3             # 96: b3 row, real (4,) + -1e30 padded lanes
PACKED_ROWS = ROW_B3 + 8         # 104 rows * 128 lanes * 4 B = 52 KiB


def mlp_kernel(x_ref, p_ref, o_ref):
    # x: (B, F).  p: (PACKED_ROWS, 128) packed/padded weights+biases.
    # Weight/bias padding is zero, so padded activation lanes stay exactly 0
    # through matmul + bias + relu.  The padded class lanes of b3 hold -1e30,
    # which makes the softmax over 128 lanes equal the softmax over the real
    # CLASSES lanes with no explicit in-kernel mask.
    x = x_ref[...]

    w1 = p_ref[ROW_W1:ROW_W1 + IN_FEATURES, :]   # (32, 128)
    b1 = p_ref[ROW_B1:ROW_B1 + 1, :]             # (1, 128)
    w2 = p_ref[ROW_W2:ROW_W2 + K2, :]            # (32, 128)
    b2 = p_ref[ROW_B2:ROW_B2 + 1, :]
    w3 = p_ref[ROW_W3:ROW_W3 + K3, :]            # (16, 128)
    b3 = p_ref[ROW_B3:ROW_B3 + 1, :]             # real classes + -1e30 pad

    h1 = jnp.dot(x, w1, preferred_element_type=jnp.float32) + b1
    h1 = jnp.maximum(h1, 0.0)                    # (B, 128), cols >= 20 are 0

    h2 = jnp.dot(h1[:, :K2], w2, preferred_element_type=jnp.float32) + b2
    h2 = jnp.maximum(h2, 0.0)                    # (B, 128), cols >= 10 are 0

    logits = jnp.dot(h2[:, :K3], w3, preferred_element_type=jnp.float32) + b3

    m = jnp.max(logits, axis=1, keepdims=True)
    e = jnp.exp(logits - m)                      # padded lanes -> exactly 0
    s = jnp.sum(e, axis=1, keepdims=True)
    o_ref[...] = e / s                           # exact divide; lane-dense store


def pack_params(params):
    """Pack + zero-pad all weights/biases into one lane-aligned f32 buffer."""
    w1, b1, w2, b2, w3, b3 = params
    p = jnp.zeros((PACKED_ROWS, LANES), jnp.float32)
    p = p.at[ROW_W1:ROW_W1 + IN_FEATURES, :HIDDEN1].set(w1)
    p = p.at[ROW_B1, :HIDDEN1].set(b1.reshape(-1))
    p = p.at[ROW_W2:ROW_W2 + HIDDEN1, :HIDDEN2].set(w2)
    p = p.at[ROW_B2, :HIDDEN2].set(b2.reshape(-1))
    p = p.at[ROW_W3:ROW_W3 + HIDDEN2, :CLASSES].set(w3)
    # b3 row: softmax mask baked into the padded class lanes.
    p = p.at[ROW_B3, :].set(NEG_MASK)
    p = p.at[ROW_B3, :CLASSES].set(b3.reshape(-1))
    return p


def net_forward(x, packed):
    B = x.shape[0]
    flops = 2 * B * (IN_FEATURES * HIDDEN1 + HIDDEN1 * HIDDEN2 + HIDDEN2 * CLASSES)
    bytes_accessed = x.size * 4 + packed.size * 4 + B * LANES * 4

    out_padded = pl.pallas_call(
        mlp_kernel,
        out_shape=jax.ShapeDtypeStruct((B, LANES), jnp.float32),
        in_specs=[
            pl.BlockSpec(x.shape, lambda: (0, 0)),
            pl.BlockSpec(packed.shape, lambda: (0, 0)),
        ],
        out_specs=pl.BlockSpec((B, LANES), lambda: (0, 0)),
        cost_estimate=pl.CostEstimate(
            flops=flops,
            transcendentals=B * LANES,
            bytes_accessed=bytes_accessed,
        ),
    )(x, packed)
    # lane-dense kernel output; slice back to the logical class width here
    # (a tiny separate XLA copy — fuses into the consumer under jit).
    return out_padded[:, :CLASSES]


def init_params(key):
    # Deterministic init mimicking nn.Linear's U(-1/sqrt(fan_in), 1/sqrt(fan_in)).
    # PyTorch stores weight as (out, in); we keep (in, out) so the kernel
    # computes x @ W directly (equivalent to x @ W_pt.T).
    def linear(k, fan_in, fan_out):
        kw, kb = jax.random.split(k)
        bound = 1.0 / jnp.sqrt(fan_in)
        w = jax.random.uniform(kw, (fan_in, fan_out), jnp.float32, -bound, bound)
        b = jax.random.uniform(kb, (1, fan_out), jnp.float32, -bound, bound)
        return w, b

    k1, k2, k3 = jax.random.split(key, 3)
    w1, b1 = linear(k1, IN_FEATURES, HIDDEN1)
    w2, b2 = linear(k2, HIDDEN1, HIDDEN2)
    w3, b3 = linear(k3, HIDDEN2, CLASSES)
    return (w1, b1, w2, b2, w3, b3)


def reference_forward(x, params):
    # Pure-JAX reference of the PyTorch forward for correctness checking.
    w1, b1, w2, b2, w3, b3 = params
    h1 = jnp.maximum(x @ w1 + b1, 0.0)
    h2 = jnp.maximum(h1 @ w2 + b2, 0.0)
    return jax.nn.softmax(h2 @ w3 + b3, axis=1)


if __name__ == "__main__":
    key = jax.random.PRNGKey(0)
    kx, kp = jax.random.split(key)

    x = jax.random.normal(kx, (BATCH, IN_FEATURES), jnp.float32)
    params = init_params(kp)
    packed = pack_params(params)          # one-time packing in the wrapper

    out = net_forward(x, packed)
    out = jax.block_until_ready(out)

    # sanity: shape, rows sum to 1, matches pure-JAX reference
    assert out.shape == (BATCH, CLASSES)
    assert jnp.allclose(jnp.sum(out, axis=1), 1.0, atol=1e-5)
    ref = reference_forward(x, params)
    assert jnp.allclose(out, ref, atol=1e-5, rtol=1e-5)

    print("KERNEL_OK")
</pallas_src>

<mosaic_0001>
module attributes {stable_mosaic.version = 11 : i64} {
  func.func @mlp_kernel(%arg0: memref<8x32xf32, #tpu.memory_space<vmem>>, %arg1: memref<104x128xf32, #tpu.memory_space<vmem>>, %arg2: memref<8x128xf32, #tpu.memory_space<vmem>>) attributes {dimension_semantics = [], scalar_prefetch = 0 : i64, scratch_operands = 0 : i64, tpu.core_type = #tpu.core_type<tc>} {
    %c0 = arith.constant 0 : index
    %c0_0 = arith.constant 0 : index
    %0 = vector.load %arg0[%c0, %c0_0] : memref<8x32xf32, #tpu.memory_space<vmem>>, vector<8x32xf32>
    %c0_1 = arith.constant 0 : index
    %c0_2 = arith.constant 0 : index
    %1 = vector.load %arg1[%c0_1, %c0_2] : memref<104x128xf32, #tpu.memory_space<vmem>>, vector<32x128xf32>
    %c32 = arith.constant 32 : index
    %c0_3 = arith.constant 0 : index
    %2 = vector.load %arg1[%c32, %c0_3] : memref<104x128xf32, #tpu.memory_space<vmem>>, vector<1x128xf32>
    %c40 = arith.constant 40 : index
    %c0_4 = arith.constant 0 : index
    %3 = vector.load %arg1[%c40, %c0_4] : memref<104x128xf32, #tpu.memory_space<vmem>>, vector<32x128xf32>
    %c72 = arith.constant 72 : index
    %c0_5 = arith.constant 0 : index
    %4 = vector.load %arg1[%c72, %c0_5] : memref<104x128xf32, #tpu.memory_space<vmem>>, vector<1x128xf32>
    %c80 = arith.constant 80 : index
    %c0_6 = arith.constant 0 : index
    %5 = vector.load %arg1[%c80, %c0_6] : memref<104x128xf32, #tpu.memory_space<vmem>>, vector<16x128xf32>
    %c96 = arith.constant 96 : index
    %c0_7 = arith.constant 0 : index
    %6 = vector.load %arg1[%c96, %c0_7] : memref<104x128xf32, #tpu.memory_space<vmem>>, vector<1x128xf32>
    %cst = arith.constant dense<0.000000e+00> : vector<8x128xf32>
    %7 = tpu.matmul %0, %1, %cst {dimension_numbers = #tpu.dot_dimension_numbers<[1], [0], [0], [1], [0, 0, 1, 1], [], []>} : vector<8x32xf32>, vector<32x128xf32>, vector<8x128xf32> -> vector<8x128xf32>
    %8 = vector.broadcast %2 : vector<1x128xf32> to vector<8x128xf32>
    %9 = arith.addf %7, %8 : vector<8x128xf32>
    %cst_8 = arith.constant 0.000000e+00 : f32
    %10 = vector.broadcast %cst_8 : f32 to vector<8x128xf32>
    %11 = arith.maximumf %9, %10 : vector<8x128xf32>
    %12 = vector.extract_strided_slice %11 {offsets = [0, 0], sizes = [8, 32], strides = [1, 1]} : vector<8x128xf32> to vector<8x32xf32>
    %cst_9 = arith.constant dense<0.000000e+00> : vector<8x128xf32>
    %13 = tpu.matmul %12, %3, %cst_9 {dimension_numbers = #tpu.dot_dimension_numbers<[1], [0], [0], [1], [0, 0, 1, 1], [], []>} : vector<8x32xf32>, vector<32x128xf32>, vector<8x128xf32> -> vector<8x128xf32>
    %14 = vector.broadcast %4 : vector<1x128xf32> to vector<8x128xf32>
    %15 = arith.addf %13, %14 : vector<8x128xf32>
    %cst_10 = arith.constant 0.000000e+00 : f32
    %16 = vector.broadcast %cst_10 : f32 to vector<8x128xf32>
    %17 = arith.maximumf %15, %16 : vector<8x128xf32>
    %18 = vector.extract_strided_slice %17 {offsets = [0, 0], sizes = [8, 16], strides = [1, 1]} : vector<8x128xf32> to vector<8x16xf32>
    %cst_11 = arith.constant dense<0.000000e+00> : vector<8x128xf32>
    %19 = tpu.matmul %18, %5, %cst_11 {dimension_numbers = #tpu.dot_dimension_numbers<[1], [0], [0], [1], [0, 0, 1, 1], [], []>} : vector<8x16xf32>, vector<16x128xf32>, vector<8x128xf32> -> vector<8x128xf32>
    %20 = vector.broadcast %6 : vector<1x128xf32> to vector<8x128xf32>
    %21 = arith.addf %19, %20 : vector<8x128xf32>
    %cst_12 = arith.constant dense<0xFF800000> : vector<8xf32>
    %22 = vector.multi_reduction <maximumf>, %21, %cst_12 [1] : vector<8x128xf32> to vector<8xf32>
    %23 = vector.shape_cast %22 : vector<8xf32> to vector<8x1xf32>
    %24 = vector.broadcast %23 : vector<8x1xf32> to vector<8x128xf32>
    %25 = arith.subf %21, %24 : vector<8x128xf32>
    %26 = math.exp %25 : vector<8x128xf32>
    %cst_13 = arith.constant dense<0.000000e+00> : vector<8xf32>
    %27 = vector.multi_reduction <add>, %26, %cst_13 [1] : vector<8x128xf32> to vector<8xf32>
    %28 = vector.shape_cast %27 : vector<8xf32> to vector<8x1xf32>
    %29 = vector.broadcast %28 : vector<8x1xf32> to vector<8x128xf32>
    %30 = arith.divf %26, %29 : vector<8x128xf32>
    %c0_14 = arith.constant 0 : index
    %c0_15 = arith.constant 0 : index
    %31 = vector.load %arg2[%c0_14, %c0_15] : memref<8x128xf32, #tpu.memory_space<vmem>>, vector<8x128xf32>
    tpu.vector_store %arg2[%c0_14, %c0_15], %30 {strides = array<i32>} : memref<8x128xf32, #tpu.memory_space<vmem>>, vector<8x128xf32>,
    return
  }
}

</mosaic_0001>

<bundles_post_ra>
// kernel: tpu_custom_call.1
= control target key start
LH: loop header
LB: loop body
LE: loop exit
PB: predicated region body
PF: predicated region fallthrough
CT: control target
= control target key end

     0   :  { %7 = vsyncpa [#allocation3], 0  ;;  %s529_s0 = inlined_call_operand.hbm [shape: f32[8,32], index: 0, kind: input, shape index: {}]   ;;  %s530_s1 = inlined_call_operand.hbm [shape: f32[104,128], index: 1, kind: input, shape index: {}]   ;;  %s531_s2 = inlined_call_operand.hbm [shape: f32[8,128], index: 2, kind: output, shape index: {}]  }
   0x1   :  { %8 = vsyncpa [#allocation6], 0 }
   0x2   :  { %9 = vsyncpa [#allocation4], 0  ;;  %s460_s9 = smov [#allocation2]   ;;  %s461_s11 = smov [#allocation5]  }
   0x3   :  { %s16_s10 = sshll.u32 %s460_s9, 4  ;;  %s25_s12 = sshll.u32 %s461_s11, 4  ;;  %s17_s10 = int_to_ptr.vmem [resolvable:$true] %s16_s10  ;;  %s483_s12 = int_to_ptr.vmem [resolvable:$true] %s25_s12 }
   0x4   :  { %s388_s15 = scalar_lea.hbm %s529_s0, 128 }
   0x5   :  { %p389_p0 = scmp.ne.s32.totalorder %s529_s0, %s388_s15  ;;  %p392_p1 = scmp.lt.u32.totalorder %s388_s15, %s529_s0 }
   0x7   :  { %p394_p2 = pnand %p392_p1, %p389_p0 }
   0x9   :  { %397 = shalt.err (!%p394_p2)
}
   0xa   :  { %s398_s20 = scalar_lea.vmem %s17_s10, 128  ;;  %p403_p4 = scmp.lt.s32.totalorder %s17_s10, %s17_s10 }
   0xb   :  { %p399_p3 = scmp.ne.s32.totalorder %s17_s10, %s398_s20  ;;  %p404_p5 = scmp.lt.s32.totalorder %s398_s20, %s398_s20 }
   0xd   :  { %p405_p6 = por %p404_p5, %p403_p4 }
   0xf   :  { %p406_p7 = pnand %p405_p6, %p399_p3 }
  0x11   :  { %409 = shalt.err (!%p406_p7)
}
  0x12   :  { %19 = dma.hbm_to_vmem [thread:$0]  %s529_s0, 128, %s17_s10, [#allocation3]  }
  0x13   :  { %s410_s25 = scalar_lea.hbm %s530_s1, 1664 }
  0x14   :  { %p411_p8 = scmp.ne.s32.totalorder %s530_s1, %s410_s25  ;;  %p414_p9 = scmp.lt.u32.totalorder %s410_s25, %s530_s1 }
  0x16   :  { %p416_p10 = pnand %p414_p9, %p411_p8 }
  0x18   :  { %419 = shalt.err (!%p416_p10)
}
  0x19   :  { %s420_s30 = scalar_lea.vmem %s483_s12, 1664  ;;  %p425_p12 = scmp.lt.s32.totalorder %s483_s12, %s483_s12 }
  0x1a   :  { %p421_p11 = scmp.ne.s32.totalorder %s483_s12, %s420_s30  ;;  %p426_p13 = scmp.lt.s32.totalorder %s420_s30, %s420_s30 }
  0x1c   :  { %p427_p0 = por %p426_p13, %p425_p12 }
  0x1e   :  { %p428_p1 = pnand %p427_p0, %p421_p11 }
  0x20   :  { %431 = shalt.err (!%p428_p1)
}
  0x21   :  { %s462_s0 = smov 128   ;;  %s463_s3 = smov 8  }
  0x22   :  { %31 = dma.hbm_to_vmem [thread:$0]  %s530_s1, 1664, %s483_s12, [#allocation6], %s462_s0, %s462_s0, %s463_s3  }
  0x23   :  { %454 = dma.done.wait [#allocation3], 128  }
  0x24   :  { %455 = vsyncadd [#allocation3], 4294967168 }
  0x25   :  { %456 = dma.done.wait [#allocation6], 1664  }
  0x26   :  { %457 = vsyncadd [#allocation6], 4294965632  ;;  %v464_v0 = vmov 0.0|0.0   ;;  %vm465_vm0 = vmmov 0   ;;  %v466_v1 = vmov 0.0   ;;  %v39_v2 = vld [vmem:[#allocation5] sm:$0xff] }
  0x27   :  { %361 = vmatprep.subr.bf16.mxu0 %v464_v0  ;;  %340 = vmatprep.mubr.msk.f32.mxu0 %vm465_vm0, %v466_v1  ;;  %v40_v3 = vld [vmem:[#allocation5 + $0x8] sm:$0xff]  ;;  %v41_v4 = vld [vmem:[#allocation5 + $0x10] sm:$0xff]  ;;  %v42_v6 = vld [vmem:[#allocation5 + $0x18] sm:$0xff]  ;;  %vm56_vm1 = vcmask 261120   ;;  %vm213_vm2 = vcmask 130048   ;;  %s467_s1 = smov [#allocation7]  }
  0x28   :  { %367 = vmatprep.subr.bf16.mxu1 %v464_v0  ;;  %351 = vmatprep.mubr.msk.f32.mxu1 %vm465_vm0, %v466_v1  ;;  %v362_v5 = vpack.c.bf16 %v40_v3, %v39_v2  ;;  %v44_v7 = vld [vmem:[#allocation5 + $0x28] sm:$0xff]  ;;  %v45_v8 = vld [vmem:[#allocation5 + $0x30] sm:$0xff]  ;;  %v365_v9 = vpack.c.bf16 %v42_v6, %v41_v4  ;;  %v38_v11 = vld [vmem:[#allocation2] sm:$0xff]  ;;  %s303_s6 = sshll.u32 %s467_s1, 4  ;;  %s304_s6 = int_to_ptr.vmem [resolvable:$true] %s303_s6 }
  0x29   :  { %v368_v10 = vpack.c.bf16 %v45_v8, %v44_v7  ;;  %v46_v12 = vld [vmem:[#allocation5 + $0x38] sm:$0xff]  ;;  %v47_v13 = vld [vmem:[#allocation5 + $0x40] sm:$0xff]  ;;  %v49_v20 = vld [vmem:[#allocation5 + $0x50] sm:$0xff]  ;;  %s432_s7 = scalar_lea.vmem %s304_s6, 128  ;;  %p437_p3 = scmp.lt.s32.totalorder %s304_s6, %s304_s6 }
  0x2a   :  { %363 = vmatpush3.bf16.msra.mxu0 %v362_v5  ;;  %v371_v14 = vpack.c.bf16 %v47_v13, %v46_v12  ;;  %v313_v15 = vld [vmem:[#allocation5 + $0x20] ss:$0 sm:$0xff]  ;;  %v50_v21 = vld [vmem:[#allocation5 + $0x58] sm:$0xff]  ;;  %v315_v23 = vld [vmem:[#allocation5 + $0x48] ss:$0 sm:$0xff]  ;;  %p433_p2 = scmp.ne.s32.totalorder %s304_s6, %s432_s7  ;;  %p438_p4 = scmp.lt.s32.totalorder %s432_s7, %s432_s7 }
  0x2b   :  { %364 = vmatprep.subr.bf16.mxu0 %v464_v0  ;;  %369 = vmatpush3.bf16.msra.mxu1 %v368_v10  ;;  %v374_v22 = vpack.c.bf16 %v50_v21, %v49_v20  ;;  %v317_v28 = vld [vmem:[#allocation5 + $0x60] ss:$0 sm:$0xff] }
  0x2c   :  { %370 = vmatprep.subr.bf16.mxu1 %v464_v0  ;;  %p439_p5 = por %p438_p4, %p437_p3 }
  0x2e   :  { %366 = vmatpush3.bf16.msra.mxu0 %v365_v9  ;;  %p440_p6 = pnand %p439_p5, %p433_p2 }
  0x2f   :  { %373 = vmatprep.subr.bf16.mxu0 %v464_v0  ;;  %372 = vmatpush3.bf16.msra.mxu1 %v371_v14 }
  0x31   :  { %341 = vmatmul.mubr.msk.f32.vlgmr.msra.gmra.mrb[0].mxu0 %vm56_vm1, %v38_v11 }
  0x32   :  { %358 = vmatprep.mubr.msk.f32.mxu0 %vm465_vm0, %v466_v1  ;;  %375 = vmatpush3.bf16.msra.mxu0 %v374_v22 }
 0x104   :  { %v126_v16 = vpop.f32.mrb[0].mxu0 }
 0x105   :  { %v127_v17 = vadd.f32 %v313_v15, %v126_v16  ;;  %v342_v18 = vpop.f32.mrb[1].mxu0 }
 0x107   :  { %v130_v19 = vmax.f32 %v127_v17, 0.0 }
 0x109   :  { %352 = vmatmul.mubr.msk.f32.vlgmr.msra.gmra.mrb[0].mxu1 %vm56_vm1, %v130_v19 }
 0x1dc   :  { %v204_v24 = vpop.f32.mrb[0].mxu1 }
 0x1dd   :  { %v205_v25 = vadd.f32 %v315_v23, %v204_v24  ;;  %v353_v26 = vpop.f32.mrb[1].mxu1 }
 0x1df   :  { %v208_v27 = vmax.f32 %v205_v25, 0.0 }
 0x1e1   :  { %359 = vmatmul.mubr.msk.f32.vlgmr.msra.gmra.mrb[2].mxu0 %vm213_vm2, %v208_v27 }
 0x2b4   :  { %v283_v29 = vpop.f32.mrb[2].mxu0 }
 0x2b5   :  { %v284_v30 = vadd.f32 %v317_v28, %v283_v29  ;;  %v360_v31 = vpop.f32.mrb[3].mxu0 }
 0x2b7   :  { %287 = vmax.xlane.f32.xlu0 %v284_v30 }
 0x344   :  { %v288_v32 = vpop.xlane.xlu0 %287 }
 0x345   :  { %v289_v33 = vsub.f32 %v284_v30, %v288_v32 }
 0x347   :  { %v290_v34 = vmul.f32 1.442695, %v289_v33 }
 0x349   :  { %384 = vpow2.f32 %v290_v34 }
 0x353   :  { %v385_v35 = vpop.eup %384 }
 0x354   :  { %292 = vadd.xlane.f32.xlu0 %v385_v35 }
 0x3e1   :  { %v293_v36 = vpop.xlane.xlu0 %292 }
 0x3e2   :  { %386 = vrcp.f32 %v293_v36 }
 0x3ec   :  { %v387_v37 = vpop.eup %386 }
 0x3ed   :  { %v295_v38 = vmul.f32 %v387_v37, %v385_v35 }
 0x3ef   :  { %296 = vst [vmem:[#allocation7] sm:$0xff] %v295_v38 }
 0x3f0   :  { %443 = shalt.err (!%p440_p6)
}
 0x3f1   :  { %s444_s10 = scalar_lea.hbm %s531_s2, 128 }
 0x3f2   :  { %p445_p7 = scmp.ne.s32.totalorder %s531_s2, %s444_s10  ;;  %p448_p8 = scmp.lt.u32.totalorder %s444_s10, %s531_s2 }
 0x3f4   :  { %p450_p9 = pnand %p448_p8, %p445_p7 }
 0x3f6   :  { %453 = shalt.err (!%p450_p9)
}
 0x3f7   :  { %306 = dma.vmem_to_hbm [thread:$0]  %s304_s6, 128, %s531_s2, [#allocation4]  }
 0x3f8   :  { %458 = dma.done.wait [#allocation4], 128  }
 0x3f9   :  { %459 = vsyncadd [#allocation4], 4294967168 }
 0x3fa   :  { %310 = vsyncpa [#allocation3], 1 }
 0x3fb   :  { %311 = vsyncpa [#allocation6], 1 }
 0x3fc   :  { %312 = vsyncpa [#allocation4], 1 }

</bundles_post_ra>
